<compile_context>
chip_gen: v5e
topology: v5e:2x2
jax: 0.10.0
libtpu: 0.0.40
codegen_flags: <defaults>
</compile_context>

<pallas_src>
import functools
import math

import jax
import jax.numpy as jnp
from jax.experimental import pallas as pl
from jax.experimental.pallas import tpu as pltpu


def _round_up(x, m):
    return ((x + m - 1) // m) * m


def fourier_projection_kernel(x_ref, f_ref, wx_ref, o_ref, *, tb, s_pad):
    """Per-token hot path: SiLU(x @ Wx + fourier_contrib[s]).

    x_ref : (tb*s_pad, I)      -- token rows for this grid step
    f_ref : (s_pad, O_pad)     -- hoisted fourier+LN+bias contribution (shared)
    wx_ref: (I, O_pad)         -- x-slice of the projection weight (shared)
    o_ref : (tb, s_pad, O_pad) -- lane-dense output block
    """
    h = jnp.dot(x_ref[...], wx_ref[...], preferred_element_type=jnp.float32)
    # Split the leading (sublane-aligned) row dim and broadcast-add the per-position
    # table; reshape does not cross (8,128) tile boundaries, so it is layout-free.
    h = h.reshape(tb, s_pad, h.shape[-1]) + f_ref[...][None]
    # SiLU activation; Dropout is identity in eval mode.
    o_ref[...] = h * jax.nn.sigmoid(h)


def make_params(input_size, output_size, num_frequencies, freq_scale=10.0, seed=0):
    """Deterministic parameter construction mirroring the module's __init__."""
    I, F, O = input_size, num_frequencies, output_size
    fourier_dim = 2 * I * F
    in_dim = I + fourier_dim

    # freq_init='linear', repeated across input channels.
    freqs = jnp.linspace(1.0, freq_scale, F, dtype=jnp.float32)
    freq_matrix = jnp.tile(freqs[None, :], (I, 1))                 # [I, F]
    phase = jnp.zeros((I, F), jnp.float32)                         # [I, F]

    ln_gamma = jnp.ones((fourier_dim,), jnp.float32)
    ln_beta = jnp.zeros((fourier_dim,), jnp.float32)

    key = jax.random.PRNGKey(seed)
    kw, kb = jax.random.split(key)
    bound = 1.0 / math.sqrt(in_dim)
    # PyTorch Linear weight is [out, in]; store transposed as [in, out].
    w = jax.random.uniform(kw, (in_dim, O), jnp.float32, -bound, bound)
    b = jax.random.uniform(kb, (O,), jnp.float32, -bound, bound)

    return dict(freq=freq_matrix, phase=phase,
                ln_gamma=ln_gamma, ln_beta=ln_beta, w=w, b=b)


def fourier_features_forward(x, params, num_frequencies, *, target_tile_rows=512):
    B, S, I = x.shape
    F = num_frequencies
    W = params["w"].astype(jnp.float32)          # [I + 2*I*F, O]
    b = params["b"].astype(jnp.float32)          # [O]
    O = W.shape[1]

    # ---- x-independent fourier branch, hoisted & folded into an [S, O] table ----
    # time_dim=1 (module default): normalized time linspace(0,1,S), identical for
    # every batch entry and input channel.
    t = jnp.linspace(0.0, 1.0, S, dtype=jnp.float32)                        # [S]
    signal = (2.0 * math.pi) * t[:, None, None] * params["freq"][None] \
             + params["phase"][None]                                        # [S, I, F]
    fe = jnp.concatenate([jnp.sin(signal), jnp.cos(signal)], axis=-1)       # [S, I, 2F]
    fe = fe.reshape(S, 2 * I * F)                                           # PyTorch order
    mean = jnp.mean(fe, axis=-1, keepdims=True)
    var = jnp.mean((fe - mean) ** 2, axis=-1, keepdims=True)
    fe = (fe - mean) * jax.lax.rsqrt(var + 1e-5) * params["ln_gamma"] + params["ln_beta"]
    f_contrib = fe @ W[I:] + b                                              # [S, O]

    # ---- padding / tiling ----
    O_pad = _round_up(max(O, 1), 128)            # lane-dense output stores
    S_pad = _round_up(S, 8)                      # sublane-aligned row tiles

    # Rows per grid step: target ~target_tile_rows, capped by a VMEM budget.
    # x + out tiles are double-buffered by the pipeline; f table + Wx fetched once.
    budget = 20 * 1024 * 1024
    fixed = 4 * (S_pad * O_pad + I * O_pad) * 2
    per_row = 4 * 2 * (I + O_pad)
    max_rows = max(S_pad, (budget - fixed) // per_row)
    TB = max(1, min(target_tile_rows, max_rows) // S_pad)   # sequences per tile
    if B >= 2:
        TB = min(TB, (B + 1) // 2)               # keep >= 2 grid steps (dual-TC chips)
    TB = min(TB, B)
    grid = pl.cdiv(B, TB)
    B_pad = grid * TB
    TN = TB * S_pad                              # token rows per grid step

    # Pad only when necessary (avoid host-side copies for aligned shapes).
    xf = x.astype(jnp.float32)
    if B_pad == B and S_pad == S:
        x_p = xf
    else:
        x_p = jnp.zeros((B_pad, S_pad, I), jnp.float32).at[:B, :S].set(xf)
    x2 = x_p.reshape(B_pad * S_pad, I)

    if S_pad == S and O_pad == O:
        f_pad = f_contrib
    else:
        f_pad = jnp.zeros((S_pad, O_pad), jnp.float32).at[:S, :O].set(f_contrib)

    if O_pad == O:
        wx_pad = W[:I]
    else:
        wx_pad = jnp.zeros((I, O_pad), jnp.float32).at[:, :O].set(W[:I])

    kernel = functools.partial(fourier_projection_kernel, tb=TB, s_pad=S_pad)
    out = pl.pallas_call(
        kernel,
        out_shape=jax.ShapeDtypeStruct((B_pad, S_pad, O_pad), jnp.float32),
        grid=(grid,),
        in_specs=[
            pl.BlockSpec((TN, I), lambda i: (i, 0)),          # x rows (pipelined)
            pl.BlockSpec((S_pad, O_pad), lambda i: (0, 0)),   # fourier table (fetched once)
            pl.BlockSpec((I, O_pad), lambda i: (0, 0)),       # Wx (fetched once)
        ],
        out_specs=pl.BlockSpec((TB, S_pad, O_pad), lambda i: (i, 0, 0)),
        compiler_params=pltpu.CompilerParams(
            dimension_semantics=("parallel",),
            vmem_limit_bytes=40 * 1024 * 1024),
    )(x2, f_pad, wx_pad)

    return out[:B, :S, :O]


def fourier_features_reference(x, params, num_frequencies):
    """Pure-JAX reference with exact PyTorch ordering/semantics (eval mode)."""
    B, S, I = x.shape
    F = num_frequencies
    time = jnp.broadcast_to(jnp.linspace(0.0, 1.0, S)[None, :, None], (B, S, I))
    signal = 2 * math.pi * time[..., None] * params["freq"][None, None] \
             + params["phase"][None, None]                             # [B,S,I,F]
    fe = jnp.concatenate([jnp.sin(signal), jnp.cos(signal)], axis=-1)   # [B,S,I,2F]
    fe = fe.reshape(B, S, 2 * I * F)
    mean = fe.mean(-1, keepdims=True)
    var = ((fe - mean) ** 2).mean(-1, keepdims=True)
    fe = (fe - mean) * jax.lax.rsqrt(var + 1e-5) * params["ln_gamma"] + params["ln_beta"]
    combined = jnp.concatenate([x, fe], axis=-1)
    h = combined @ params["w"] + params["b"]
    return h * jax.nn.sigmoid(h)


if __name__ == "__main__":
    B, S, I, O, F = 2, 8, 4, 32, 10
    key = jax.random.PRNGKey(0)
    x = jax.random.normal(key, (B, S, I), jnp.float32)
    params = make_params(I, O, F, freq_scale=10.0, seed=0)

    out = fourier_features_forward(x, params, F)
    out = jax.block_until_ready(out)

    ref = fourier_features_reference(x, params, F)
    assert out.shape == (B, S, O)
    err = jnp.max(jnp.abs(out - ref))
    assert jnp.allclose(out, ref, atol=1e-4, rtol=1e-4), f"max abs err {err}"

    print("KERNEL_OK")
</pallas_src>

<mosaic_0001>
module attributes {stable_mosaic.version = 11 : i64} {
  func.func @fourier_projection_kernel(%arg0: i32, %arg1: memref<8x4xf32, #tpu.memory_space<vmem>>, %arg2: memref<8x128xf32, #tpu.memory_space<vmem>>, %arg3: memref<4x128xf32, #tpu.memory_space<vmem>>, %arg4: memref<1x8x128xf32, #tpu.memory_space<vmem>>) attributes {dimension_semantics = [#tpu.dimension_semantics<parallel>], iteration_bounds = array<i64: 2>, scalar_prefetch = 0 : i64, scratch_operands = 0 : i64, tpu.core_type = #tpu.core_type<tc>, window_params = [{transform_indices = @transform_0, window_bounds = array<i64: 8, 4>}, {pipeline_mode = #tpu.pipeline_mode<synchronous>, transform_indices = @transform_1, window_bounds = array<i64: 8, 128>}, {pipeline_mode = #tpu.pipeline_mode<synchronous>, transform_indices = @transform_2, window_bounds = array<i64: 4, 128>}, {transform_indices = @transform_3, window_bounds = array<i64: 1, 8, 128>}]} {
    %c0 = arith.constant 0 : index
    %c0_0 = arith.constant 0 : index
    %0 = vector.load %arg1[%c0, %c0_0] : memref<8x4xf32, #tpu.memory_space<vmem>>, vector<8x4xf32>
    %c0_1 = arith.constant 0 : index
    %c0_2 = arith.constant 0 : index
    %1 = vector.load %arg3[%c0_1, %c0_2] : memref<4x128xf32, #tpu.memory_space<vmem>>, vector<4x128xf32>
    %cst = arith.constant dense<0.000000e+00> : vector<8x128xf32>
    %2 = tpu.matmul %0, %1, %cst {dimension_numbers = #tpu.dot_dimension_numbers<[1], [0], [0], [1], [0, 0, 1, 1], [], []>} : vector<8x4xf32>, vector<4x128xf32>, vector<8x128xf32> -> vector<8x128xf32>
    %3 = vector.shape_cast %2 : vector<8x128xf32> to vector<1x8x128xf32>
    %c0_3 = arith.constant 0 : index
    %c0_4 = arith.constant 0 : index
    %4 = vector.load %arg2[%c0_3, %c0_4] : memref<8x128xf32, #tpu.memory_space<vmem>>, vector<8x128xf32>
    %5 = vector.shape_cast %4 : vector<8x128xf32> to vector<1x8x128xf32>
    %6 = arith.addf %3, %5 : vector<1x8x128xf32>
    %7 = arith.negf %6 : vector<1x8x128xf32>
    %8 = math.exp %7 : vector<1x8x128xf32>
    %cst_5 = arith.constant 1.000000e+00 : f32
    %9 = vector.broadcast %cst_5 : f32 to vector<1x8x128xf32>
    %10 = arith.addf %9, %8 : vector<1x8x128xf32>
    %11 = arith.divf %9, %10 : vector<1x8x128xf32>
    %12 = arith.mulf %6, %11 : vector<1x8x128xf32>
    %c0_6 = arith.constant 0 : index
    %c0_7 = arith.constant 0 : index
    %c0_8 = arith.constant 0 : index
    %13 = vector.load %arg4[%c0_6, %c0_7, %c0_8] : memref<1x8x128xf32, #tpu.memory_space<vmem>>, vector<1x8x128xf32>
    tpu.vector_store %arg4[%c0_6, %c0_7, %c0_8], %12 {strides = array<i32>} : memref<1x8x128xf32, #tpu.memory_space<vmem>>, vector<1x8x128xf32>,
    return
  }
  func.func @transform_0(%arg0: i32) -> (i32, i32) {
    %c0_i32 = arith.constant 0 : i32
    %c0_i32_0 = arith.constant 0 : i32
    return %arg0, %c0_i32 : i32, i32
  }
  func.func @transform_1(%arg0: i32) -> (i32, i32) {
    %c0_i32 = arith.constant 0 : i32
    %c0_i32_0 = arith.constant 0 : i32
    %c0_i32_1 = arith.constant 0 : i32
    return %c0_i32, %c0_i32_0 : i32, i32
  }
  func.func @transform_2(%arg0: i32) -> (i32, i32) {
    %c0_i32 = arith.constant 0 : i32
    %c0_i32_0 = arith.constant 0 : i32
    %c0_i32_1 = arith.constant 0 : i32
    return %c0_i32, %c0_i32_0 : i32, i32
  }
  func.func @transform_3(%arg0: i32) -> (i32, i32, i32) {
    %c0_i32 = arith.constant 0 : i32
    %c0_i32_0 = arith.constant 0 : i32
    %c0_i32_1 = arith.constant 0 : i32
    return %arg0, %c0_i32, %c0_i32_0 : i32, i32, i32
  }
}

</mosaic_0001>

<bundles_post_ra>
// kernel: tpu_custom_call.1
= control target key start
LH: loop header
LB: loop body
LE: loop exit
PB: predicated region body
PF: predicated region fallthrough
CT: control target
= control target key end

     0   :  { %8 = vsyncpa [#allocation3], 0  ;;  %s525_s0 = inlined_call_operand.vmem [shape: f32[16,4], index: 0, kind: input, shape index: {}]   ;;  %s526_s1 = inlined_call_operand.vmem [shape: f32[8,128], index: 1, kind: input, shape index: {}]   ;;  %s527_s2 = inlined_call_operand.vmem [shape: f32[4,128], index: 2, kind: input, shape index: {}]   ;;  %s528_s3 = inlined_call_operand.hbm [shape: f32[2,8,128], index: 3, kind: output, shape index: {}]  }
   0x1   :  { %10 = vsyncpa [#allocation3 + $0x1], 0  ;;  %s434_s12 = smov 0   ;;  %s436_s13 = smov 0  }
   0x2   :  { %s438_s14 = smov 0   ;;  %s440_s15 = smov 0  }
   0x3 LB: > { %s455_s16 = sadd.s32 4294967295, %s412_s15   ;;  %s294_s17 = sadd.s32 4294967294, %s412_s15   ;;  %s412_s15 = sphi %s440_s15, %s534_s15   ;;  %s408_s14 = sphi %s438_s14, %s533_s14   ;;  %s404_s13 = sphi %s436_s13, %s532_s13   ;;  %s400_s12 = sphi %s434_s12, %s531_s12  }
   0x4   : > { %s459_s18 = sadd.s32 1, %s412_s15   ;;  %s91_s19 = sadd.s32 1, %s408_s14 }
   0x5   : > { %s88_s20 = ssub.s32 %s412_s15, %s459_s18  ;;  %p101_p0 = scmp.ne.s32.totalorder %s408_s14, %s404_s13 }
   0x6   : > { %p89_p1 = scmp.eq.s32.totalorder %s88_s20, 0  ;;  %p102_p2 = scmp.eq.s32.totalorder %s455_s16, 1 }
   0x7   : > { %p107_p3 = scmp.ne.s32.totalorder %s404_s13, %s400_s12  ;;  %p108_p4 = scmp.eq.s32.totalorder %s294_s17, 1 }
   0x8   : > { %s470_s21 = scalar_select %p89_p1, %s408_s14, %s91_s19  }
   0x9   : > { %p472_p5 = por %p102_p2, %p101_p0  ;;  %p476_p6 = por %p108_p4, %p107_p3 }
   0xa   : > { %p297_p7 = scmp.ge.s32.totalorder %s412_s15, 1  ;;  %p139_p8 = scmp.lt.s32.totalorder %s412_s15, 3 }
   0xc   : > { %p140_p9 = pnand %p297_p7, %p139_p8 }
   0xd   : > { %p162_p10 = scmp.lt.s32.totalorder (!%p140_p9), %s455_s16, 1  ;;  %s159_s6 = sand.u32 (!%p140_p9), 1, %s404_s13  }
   0xe   : > { %143 = sbr.rel (%p140_p9) target bundleno = 185 (0xb9), region = 32  ;;  %s298_s7 = sshll.u32 (!%p140_p9), %s159_s6, 3 }
   0xf   : > { %s304_s8 = sshll.u32 (!%p140_p9), %s455_s16, 3  ;;  %s161_s17 = scalar_lea.vmem (!%p140_p9), [#allocation2], %s298_s7 }
  0x10   : > { %s230_s11 = scalar_lea.hbm (!%p140_p9), %s528_s3, %s304_s8  ;;  %s232_s19 = sshll.u32 (!%p140_p9), %s161_s17, 4  ;;  %s233_s19 = int_to_ptr.vmem [resolvable:$true] %s232_s19 }
  0x11   : > { %s234_s20 = sshll.u32 (!%p140_p9), %s230_s11, 4  ;;  %s370_s28 = scalar_lea.hbm (!%p140_p9), %s528_s3, 16  ;;  %s235_s20 = int_to_ptr.hbm [resolvable:$true] %s234_s20 }
  0x12   : > { %s364_s24 = sshra.s32 (!%p140_p9), %s235_s20, 4  ;;  %s365_s24 = int_to_ptr.hbm [resolvable:$true] %s364_s24 }
  0x13   : > { %v167_v0 = vld [vmem:[%s527_s2] sm:$0xf]  ;;  %vm172_vm0 = vcmask 1043456   ;;  %s163_s26 = scalar_select %p162_p10, %s455_s16, 1  ;;  %vm168_vm1 = vcmask 31744  }
  0x14   : > { %300 = vmatpush.msk.msra.mxu0 %vm172_vm0, %v167_v0  ;;  %v196_v2 = vld [vmem:[%s526_s1] sm:$0xff]  ;;  %s220_s16 = scalar_lea.sflag [#allocation3], %s159_s6  ;;  %s366_s25 = scalar_lea.hbm %s365_s24, 8 }
  0x15   : > { %s299_s27 = sshll.u32 %s163_s26, 3  ;;  %p367_p11 = scmp.ne.s32.totalorder %s365_s24, %s366_s25 }
  0x16   : > { %s165_s30 = scalar_lea.vmem %s525_s0, %s299_s27  ;;  %p371_p0 = scmp.lt.s32.totalorder %s365_s24, %s528_s3 }
  0x17   : > { %v166_v1 = vld [vmem:[%s165_s30] sm:$0xff]  ;;  %p368_p12 = pnand %p367_p11, %p472_p5  ;;  %p372_p1 = scmp.lt.s32.totalorder %s370_s28, %s366_s25 }
  0x18   : > { %301 = vmatmul.msk.f32.vlgmr.msra.gmra.mxu0 %vm168_vm1, %v166_v1 }
  0x19   : > { %p369_p13 = pneg %p368_p12  ;;  %p373_p2 = por %p372_p1, %p371_p0 }
  0x1b   : > { %p374_p3 = pnand %p373_p2, %p369_p13 }
  0x95   : > { %v193_v3 = vpop.f32.mrf.mxu0 }
  0x96   : > { %v197_v4 = vadd.f32 %v196_v2, %v193_v3 }
  0x98   : > { %v302_v5 = vmul.f32 -1.442695, %v197_v4 }
  0x9a   : > { %346 = vpow2.f32 %v302_v5 }
  0xa0   : > { %v347_v6 = vpop.eup %346 }
  0xa1   : > { %v201_v7 = vadd.f32 1.0, %v347_v6 }
  0xa3   : > { %348 = vrcp.f32 %v201_v7  ;;  %v213_v11 = vand.u32 2147483648, %v201_v7  ;;  %v211_v13 = vand.u32 2147483647, %v201_v7  ;;  %vm207_vm3 = vweird.f32 %v201_v7 }
  0xa5   : > { %v214_v15 = vor.u32 1.1754944e-38, %v213_v11  ;;  %vm212_vm5 = vcmp.eq.f32.partialorder %v211_v13, 8.507059e+37 }
  0xa9   : > { %v349_v8 = vpop.eup %348 }
  0xaa   : > { %v203_v9 = vmul.f32 %v349_v8, %v201_v7  ;;  %vm208_vm2 = vweird.f32 %v349_v8 }
  0xab   : > { %vm209_vm4 = vmor %vm207_vm3, %vm208_vm2 }
  0xac   : > { %v204_v10 = vsub.f32 1.0, %v203_v9 }
  0xae   : > { %v205_v12 = vmul.f32 %v349_v8, %v204_v10 }
  0xb0   : > { %v206_v14 = vadd.f32 %v349_v8, %v205_v12 }
  0xb2   : > { %v210_v16 = vsel %vm209_vm4, %v349_v8, %v206_v14 }
  0xb3   : > { %v215_v17 = vsel %vm212_vm5, %v214_v15, %v210_v16 }
  0xb4   : > { %v217_v18 = vmul.f32 %v215_v17, %v197_v4 }
  0xb6   : > { %218 = vst [vmem:[%s161_s17] sm:$0xff] %v217_v18 }
  0xb7   : > { %377 = shalt.err (!%p374_p3)
}
  0xb8   : > { %307 = dma.vmem_to_hbm [thread:$0]  (%p472_p5), %s233_s19, 128, %s235_s20, %s220_s16  }
  0xb9 PF: > { %p313_p4 = scmp.ge.s32.totalorder %s412_s15, 2  ;;  %s246_s4 = sand.u32 1, %s400_s12  }
  0xba   : > { %s247_s5 = scalar_lea.sflag [#allocation3], %s246_s4 }
  0xbb   : > { %p310_p7 = pnand %p313_p4, %p476_p6 }
  0xbd   : > { %p311_p8 = pneg %p310_p7 }
  0xbf   : > { %395 = dma.done.wait (%p311_p8), %s247_s5, 128  }
  0xc0   : > { %397 = vsyncadd (%p311_p8), %s247_s5, 4294967168  ;;  %p13_p9 = scmp.ge.s32.totalorder %s459_s18, 4   ;;  %s531_s12 = smov %s404_s13 }
  0xc1   : > { %s532_s13 = smov %s408_s14  ;;  %s533_s14 = smov %s470_s21 }
  0xc2   : > { %s534_s15 = smov %s459_s18  ;;  %15 = sbr.rel (!%p13_p9) target bundleno = 3 (0x3), region = 67 }
  0xc7   :  { %253 = vsyncpa [#allocation3], 1 }
  0xc8   :  { %255 = vsyncpa [#allocation3 + $0x1], 1 }

</bundles_post_ra>
